<compile_context>
chip_gen: v7x
topology: tpu7x:2x2x1
jax: 0.10.0
libtpu: 0.0.40
codegen_flags: <defaults>
</compile_context>

<pallas_src>
import functools

import jax
import jax.numpy as jnp
from jax import lax
from jax.experimental import pallas as pl
from jax.experimental.pallas import tpu as pltpu


# ---------------------------------------------------------------------------
# Batched linear projection: out = x @ W + b (bf16 operands, fp32 accumulate).
# Used for the hoisted i2h and output projections with M = T*B.
# ---------------------------------------------------------------------------
def _linear_kernel(x_ref, w_ref, b_ref, o_ref):
    o_ref[...] = (
        jnp.dot(x_ref[...], w_ref[...], preferred_element_type=jnp.float32)
        + b_ref[...]
    ).astype(o_ref.dtype)


def linear(x, w, b, out_dtype=jnp.float32, tm=None):
    """x: (M, K) bf16, w: (K, N) bf16, b: (1, N) fp32 -> (M, N) out_dtype."""
    M, K = x.shape
    N = w.shape[1]
    if tm is None:
        # Whole M in one tile for small problems; otherwise the largest nice
        # row-tile that divides M (keeps the (8,128) constraint satisfied).
        tm = M if M <= 512 else next(
            (c for c in (512, 256, 128, 64, 32, 16, 8) if M % c == 0), M)
    grid = (M // tm,)
    return pl.pallas_call(
        _linear_kernel,
        out_shape=jax.ShapeDtypeStruct((M, N), out_dtype),
        grid_spec=pltpu.PrefetchScalarGridSpec(
            num_scalar_prefetch=0,
            grid=grid,
            in_specs=[
                pl.BlockSpec((tm, K), lambda i: (i, 0)),
                pl.BlockSpec((K, N), lambda i: (0, 0)),   # weight, VMEM-resident
                pl.BlockSpec((1, N), lambda i: (0, 0)),   # bias
            ],
            out_specs=pl.BlockSpec((tm, N), lambda i: (i, 0)),
        ),
        compiler_params=pltpu.CompilerParams(
            dimension_semantics=("parallel",)),
        cost_estimate=pl.CostEstimate(
            flops=2 * M * K * N,
            transcendentals=0,
            bytes_accessed=2 * M * K + 2 * K * N + 4 * N + 4 * M * N),
    )(x, w, b)


# ---------------------------------------------------------------------------
# Serial recurrence: h_t = tanh(i2h_t + h_{t-1} @ Wh), U steps per grid step.
# ---------------------------------------------------------------------------
def _rnn_recurrence_kernel(i2h_ref, h0_ref, wh_ref, hseq_ref, hfin_ref,
                           h_carry, *, unroll):
    g = pl.program_id(0)

    # Seed the fp32 VMEM hidden carry from the (1|B, hid) initial hidden.
    @pl.when(g == 0)
    def _seed_hidden():
        h_carry[...] = jnp.broadcast_to(
            h0_ref[...].astype(jnp.float32), h_carry.shape)

    wh = wh_ref[...]                       # (hid, hid) bf16, stays in VMEM

    def step(u, h):
        # i2h_t already contains i2h(x_t) + (b_i2h + b_h2h); only the small
        # h @ Wh matmul and the tanh remain on the per-step critical path.
        combined = i2h_ref[u] + jnp.dot(
            h.astype(jnp.bfloat16), wh, preferred_element_type=jnp.float32)
        h_new = jnp.tanh(combined)                       # fp32 tanh on the EUP
        hseq_ref[u] = h_new.astype(hseq_ref.dtype)       # bf16 hidden-seq store
        return h_new

    h_last = lax.fori_loop(0, unroll, step, h_carry[...], unroll=True)
    h_carry[...] = h_last

    # Persistent hidden state written back only once, at the very last step.
    @pl.when(g == pl.num_programs(0) - 1)
    def _write_final_hidden():
        hfin_ref[...] = h_last


def prediction_rnn_forward(x_seq, hidden, params, *, unroll=4,
                           donate_hidden=False):
    """Fused multi-timestep forward.

    x_seq:  [T, B, input_size]
    hidden: [1, hidden_size] (fresh init_hidden) or [B, hidden_size]
    Returns (out_seq [T, B, out_dim] fp32, h_final [B, hidden_size] fp32).
    T = 1 reproduces the module's single-step forward exactly.
    """
    wi, bi, wh, bh, wo, bo = params
    T, B, in_dim = x_seq.shape
    hid = wi.shape[1]
    out_dim = wo.shape[1]

    # Largest unroll factor <= requested that divides T.
    unroll = max(1, min(unroll, T))
    while T % unroll:
        unroll -= 1
    n_steps = T // unroll

    # bf16 matmul operands; fp32 biases / accumulation / carried hidden.
    wi_bf = wi.astype(jnp.bfloat16)
    wh_bf = wh.astype(jnp.bfloat16)
    wo_bf = wo.astype(jnp.bfloat16)
    b_ih = (bi + bh).reshape(1, hid).astype(jnp.float32)   # pre-summed bias
    bo2 = bo.reshape(1, out_dim).astype(jnp.float32)
    h0 = hidden.astype(jnp.float32)
    hB = h0.shape[0]

    # Phase 1: hoisted i2h projection over the whole sequence (M = T*B).
    x2d = x_seq.reshape(T * B, in_dim).astype(jnp.bfloat16)
    i2h = linear(x2d, wi_bf, b_ih, out_dtype=jnp.float32).reshape(T, B, hid)

    # Phase 2: the serial recurrence only.
    const = lambda shape: pl.BlockSpec(shape, lambda g: tuple(0 for _ in shape))
    cost = pl.CostEstimate(
        flops=2 * T * B * hid * hid,
        transcendentals=T * B * hid,
        bytes_accessed=(4 * T * B * hid          # i2h in (fp32)
                        + 2 * T * B * hid        # h_seq out (bf16)
                        + 2 * hid * hid          # Wh (bf16)
                        + 4 * (hB + B) * hid),   # hidden in / final out
    )
    # Optional in-place update of the persistent hidden (matches the module's
    # `self.hidden = ...`); opt-in because it donates the caller's buffer.
    aliases = {1: 1} if (donate_hidden and hB == B) else {}

    h_seq, h_final = pl.pallas_call(
        functools.partial(_rnn_recurrence_kernel, unroll=unroll),
        out_shape=(
            jax.ShapeDtypeStruct((T, B, hid), jnp.bfloat16),
            jax.ShapeDtypeStruct((B, hid), jnp.float32),
        ),
        grid_spec=pltpu.PrefetchScalarGridSpec(
            num_scalar_prefetch=0,
            grid=(n_steps,),
            in_specs=[
                pl.BlockSpec((unroll, B, hid), lambda g: (g, 0, 0)),  # i2h_t
                const((hB, hid)),     # initial hidden (read only at g == 0)
                const((hid, hid)),    # Wh, VMEM-resident across all steps
            ],
            out_specs=[
                pl.BlockSpec((unroll, B, hid), lambda g: (g, 0, 0)),  # h_seq
                const((B, hid)),                                      # h_final
            ],
            scratch_shapes=[pltpu.VMEM((B, hid), jnp.float32)],  # hidden carry
        ),
        compiler_params=pltpu.CompilerParams(
            dimension_semantics=("arbitrary",)),
        cost_estimate=cost,
        input_output_aliases=aliases,
    )(i2h, h0, wh_bf)

    # Phase 3: hoisted output projection over the whole sequence (M = T*B).
    out2d = linear(h_seq.reshape(T * B, hid), wo_bf, bo2,
                   out_dtype=jnp.float32)
    out_seq = out2d.reshape(T, B, out_dim)
    return out_seq, h_final


def prediction_rnn_step(x, hidden, params):
    """Single-step forward matching the module's `forward(input_vec)`."""
    out_seq, h_new = prediction_rnn_forward(x[None], hidden, params, unroll=1)
    return out_seq[0], h_new


def init_params(key, input_size, hidden_size, out_dim):
    """Deterministic nn.Linear-style init: U(-1/sqrt(fan_in), 1/sqrt(fan_in)).
    Weights are stored transposed: [fan_in, fan_out]."""
    ks = jax.random.split(key, 6)

    def lin(kw, kb, fan_in, fan_out):
        bound = 1.0 / jnp.sqrt(fan_in)
        w = jax.random.uniform(kw, (fan_in, fan_out), jnp.float32, -bound, bound)
        b = jax.random.uniform(kb, (fan_out,), jnp.float32, -bound, bound)
        return w, b

    wi, bi = lin(ks[0], ks[1], input_size, hidden_size)   # i2h
    wh, bh = lin(ks[2], ks[3], hidden_size, hidden_size)  # h2h
    wo, bo = lin(ks[4], ks[5], hidden_size, out_dim)      # output_layer
    return (wi, bi, wh, bh, wo, bo)


def reference_forward(x_seq, hidden, params):
    """Pure-JAX reference with the same bf16-operand / fp32-accumulate math."""
    wi, bi, wh, bh, wo, bo = params
    wi_bf, wh_bf, wo_bf = (w.astype(jnp.bfloat16) for w in (wi, wh, wo))
    b_ih = (bi + bh).astype(jnp.float32)
    B = x_seq.shape[1]
    h = jnp.broadcast_to(hidden.astype(jnp.float32), (B, wi.shape[1]))
    outs = []
    for t in range(x_seq.shape[0]):
        x_bf = x_seq[t].astype(jnp.bfloat16)
        combined = (
            jnp.dot(x_bf, wi_bf, preferred_element_type=jnp.float32)
            + jnp.dot(h.astype(jnp.bfloat16), wh_bf,
                      preferred_element_type=jnp.float32)
            + b_ih)
        h = jnp.tanh(combined)
        outs.append(jnp.dot(h.astype(jnp.bfloat16), wo_bf,
                            preferred_element_type=jnp.float32) + bo)
    return jnp.stack(outs, axis=0), h


if __name__ == "__main__":
    # Small shapes consistent with the module (scaled down from 2048/512/2048):
    # seq=8, batch=8, input=256, hidden=128, out=256 — all (8,128)-friendly.
    T, B, INPUT, HIDDEN, OUT = 8, 8, 256, 128, 256

    key = jax.random.PRNGKey(0)
    k_x, k_x2, k_p = jax.random.split(key, 3)

    params = init_params(k_p, INPUT, HIDDEN, OUT)
    x_seq = jax.random.normal(k_x, (T, B, INPUT), jnp.float32)
    hidden0 = jnp.zeros((1, HIDDEN), jnp.float32)   # init_hidden()

    # First call: fresh (1, H) hidden, broadcast in-kernel at step 0.
    out_seq, h1 = prediction_rnn_forward(x_seq, hidden0, params, unroll=4)
    out_seq = jax.block_until_ready(out_seq)
    h1 = jax.block_until_ready(h1)

    ref_out, ref_h = reference_forward(x_seq, hidden0, params)
    assert jnp.allclose(out_seq, ref_out, atol=1e-2, rtol=1e-2)
    assert jnp.allclose(h1, ref_h, atol=1e-2, rtol=1e-2)

    # Second call: (B, H) hidden exercises the in-place-aliasing path and the
    # carried-state semantics across calls (h1 is donated and not reused).
    x_seq2 = jax.random.normal(k_x2, (T, B, INPUT), jnp.float32)
    out2, h2 = prediction_rnn_forward(x_seq2, h1, params, unroll=4,
                                      donate_hidden=True)
    out2 = jax.block_until_ready(out2)
    h2 = jax.block_until_ready(h2)

    ref_out2, ref_h2 = reference_forward(x_seq2, ref_h, params)
    assert jnp.allclose(out2, ref_out2, atol=1e-2, rtol=1e-2)
    assert jnp.allclose(h2, ref_h2, atol=1e-2, rtol=1e-2)

    print("KERNEL_OK")
</pallas_src>

<mosaic_0001>
module attributes {stable_mosaic.version = 11 : i64} {
  func.func @_linear_kernel(%arg0: i32, %arg1: memref<64x256xbf16, #tpu.memory_space<vmem>>, %arg2: memref<256x128xbf16, #tpu.memory_space<vmem>>, %arg3: memref<1x128xf32, #tpu.memory_space<vmem>>, %arg4: memref<64x128xf32, #tpu.memory_space<vmem>>) attributes {dimension_semantics = [#tpu.dimension_semantics<parallel>], iteration_bounds = array<i64: 1>, scalar_prefetch = 0 : i64, scratch_operands = 0 : i64, tpu.core_type = #tpu.core_type<tc>, window_params = [{transform_indices = @transform_0, window_bounds = array<i64: 64, 256>}, {pipeline_mode = #tpu.pipeline_mode<synchronous>, transform_indices = @transform_1, window_bounds = array<i64: 256, 128>}, {pipeline_mode = #tpu.pipeline_mode<synchronous>, transform_indices = @transform_2, window_bounds = array<i64: 1, 128>}, {transform_indices = @transform_3, window_bounds = array<i64: 64, 128>}]} {
    %c0 = arith.constant 0 : index
    %c0_0 = arith.constant 0 : index
    %0 = vector.load %arg1[%c0, %c0_0] : memref<64x256xbf16, #tpu.memory_space<vmem>>, vector<64x256xbf16>
    %c0_1 = arith.constant 0 : index
    %c0_2 = arith.constant 0 : index
    %1 = vector.load %arg2[%c0_1, %c0_2] : memref<256x128xbf16, #tpu.memory_space<vmem>>, vector<256x128xbf16>
    %cst = arith.constant dense<0.000000e+00> : vector<64x128xf32>
    %2 = tpu.matmul %0, %1, %cst {dimension_numbers = #tpu.dot_dimension_numbers<[1], [0], [0], [1], [0, 0, 1, 1], [], []>} : vector<64x256xbf16>, vector<256x128xbf16>, vector<64x128xf32> -> vector<64x128xf32>
    %c0_3 = arith.constant 0 : index
    %c0_4 = arith.constant 0 : index
    %3 = vector.load %arg3[%c0_3, %c0_4] : memref<1x128xf32, #tpu.memory_space<vmem>>, vector<1x128xf32>
    %4 = vector.broadcast %3 : vector<1x128xf32> to vector<64x128xf32>
    %5 = arith.addf %2, %4 : vector<64x128xf32>
    %c0_5 = arith.constant 0 : index
    %c0_6 = arith.constant 0 : index
    %6 = vector.load %arg4[%c0_5, %c0_6] : memref<64x128xf32, #tpu.memory_space<vmem>>, vector<64x128xf32>
    tpu.vector_store %arg4[%c0_5, %c0_6], %5 {strides = array<i32>} : memref<64x128xf32, #tpu.memory_space<vmem>>, vector<64x128xf32>,
    return
  }
  func.func @transform_0(%arg0: i32) -> (i32, i32) {
    %c0_i32 = arith.constant 0 : i32
    %c0_i32_0 = arith.constant 0 : i32
    return %arg0, %c0_i32 : i32, i32
  }
  func.func @transform_1(%arg0: i32) -> (i32, i32) {
    %c0_i32 = arith.constant 0 : i32
    %c0_i32_0 = arith.constant 0 : i32
    %c0_i32_1 = arith.constant 0 : i32
    return %c0_i32, %c0_i32_0 : i32, i32
  }
  func.func @transform_2(%arg0: i32) -> (i32, i32) {
    %c0_i32 = arith.constant 0 : i32
    %c0_i32_0 = arith.constant 0 : i32
    %c0_i32_1 = arith.constant 0 : i32
    return %c0_i32, %c0_i32_0 : i32, i32
  }
  func.func @transform_3(%arg0: i32) -> (i32, i32) {
    %c0_i32 = arith.constant 0 : i32
    %c0_i32_0 = arith.constant 0 : i32
    return %arg0, %c0_i32 : i32, i32
  }
}

</mosaic_0001>

<bundles_post_ra>
// kernel: tpu_custom_call.1
= control target key start
LH: loop header
LB: loop body
LE: loop exit
PB: predicated region body
PF: predicated region fallthrough
CT: control target
= control target key end

     0   :  { %8 = vsyncpa [#allocation3], 0  ;;  %s578_s0 = inlined_call_operand.hbm [shape: bf16[64,256], index: 0, kind: input, shape index: {}]   ;;  %s579_s1 = inlined_call_operand.hbm [shape: bf16[256,128], index: 1, kind: input, shape index: {}]   ;;  %s580_s2 = inlined_call_operand.vmem [shape: f32[1,128], index: 2, kind: input, shape index: {}]   ;;  %s581_s3 = inlined_call_operand.hbm [shape: f32[64,128], index: 3, kind: output, shape index: {}]  }
   0x1   :  { %9 = vsyncpa [#allocation6], 0 }
   0x2   :  { %10 = vsyncpa [#allocation4], 0  ;;  %s506_s12 = smov [#allocation2]   ;;  %s434_s16 = scalar_lea.hbm %s578_s0, 1024 }
   0x3   :  { %s16_s13 = sshll.u32 %s506_s12, 4  ;;  %p435_p0 = scmp.ne.s32.totalorder %s578_s0, %s434_s16  ;;  %s17_s13 = int_to_ptr.vmem [resolvable:$true] %s16_s13 }
   0x4   :  { %p438_p1 = scmp.lt.u32.totalorder %s434_s16, %s578_s0 }
   0x6   :  { %p440_p2 = pnand %p438_p1, %p435_p0 }
   0x8   :  { %443 = shalt.err (!%p440_p2)
}
   0x9   :  { %s444_s21 = scalar_lea.vmem %s17_s13, 1024  ;;  %p449_p4 = scmp.lt.s32.totalorder %s17_s13, %s17_s13 }
   0xa   :  { %p445_p3 = scmp.ne.s32.totalorder %s17_s13, %s444_s21  ;;  %p450_p5 = scmp.lt.s32.totalorder %s444_s21, %s444_s21 }
   0xc   :  { %p451_p6 = por %p450_p5, %p449_p4 }
   0xe   :  { %p452_p7 = pnand %p451_p6, %p445_p3 }
  0x10   :  { %455 = shalt.err (!%p452_p7)
}
  0x11   :  { %s507_s22 = smov 128   ;;  %s508_s23 = smov 8  }
  0x12   :  { %22 = dma.hbm_to_vmem [thread:$0]  %s578_s0, 1024, %s17_s13, [#allocation3], %s507_s22, %s507_s22, %s508_s23  }
  0x13   :  { %s509_s26 = smov [#allocation5]   ;;  %s456_s30 = scalar_lea.hbm %s579_s1, 2048 }
  0x14   :  { %s28_s27 = sshll.u32 %s509_s26, 4  ;;  %p457_p8 = scmp.ne.s32.totalorder %s579_s1, %s456_s30  ;;  %s29_s27 = int_to_ptr.vmem [resolvable:$true] %s28_s27 }
  0x15   :  { %p460_p9 = scmp.lt.u32.totalorder %s456_s30, %s579_s1 }
  0x17   :  { %p462_p10 = pnand %p460_p9, %p457_p8 }
  0x19   :  { %465 = shalt.err (!%p462_p10)
}
  0x1a   :  { %s466_s8 = scalar_lea.vmem %s29_s27, 2048  ;;  %p471_p12 = scmp.lt.s32.totalorder %s29_s27, %s29_s27 }
  0x1b   :  { %p467_p11 = scmp.ne.s32.totalorder %s29_s27, %s466_s8  ;;  %p472_p13 = scmp.lt.s32.totalorder %s466_s8, %s466_s8 }
  0x1d   :  { %p473_p0 = por %p472_p13, %p471_p12 }
  0x1f   :  { %p474_p1 = pnand %p473_p0, %p467_p11 }
  0x21   :  { %477 = shalt.err (!%p474_p1)
}
  0x22   :  { %s510_s0 = smov 64   ;;  %s511_s9 = smov 4  }
  0x23   :  { %34 = dma.hbm_to_vmem [thread:$0]  %s579_s1, 2048, %s29_s27, [#allocation6], %s510_s0, %s510_s0, %s511_s9  }
  0x24   :  { %500 = dma.done.wait [#allocation3], 1024  }
  0x25   :  { %501 = vsyncadd [#allocation3], 4294966272 }
  0x26   :  { %502 = dma.done.wait [#allocation6], 2048  }
  0x27   :  { %503 = vsyncadd [#allocation6], 4294965248  ;;  %v406_v0 = vld [vmem:[#allocation5 + $0x40] sm:$0xff]   ;;  %v408_v2 = vld [vmem:[#allocation5 + $0x48] sm:$0xff]  }
  0x28   :  { %v407_v1 = vld [vmem:[#allocation5] sm:$0xff]   ;;  %343 = vmatprep.subr.bf16.mxu0 %v406_v0  ;;  %383 = vmatprep.subr.bf16.mxu1 %v406_v0  ;;  %v409_v3 = vld [vmem:[#allocation5 + $0x8] sm:$0xff]   ;;  %v410_v4 = vld [vmem:[#allocation5 + $0x50] sm:$0xff]  }
  0x29   :  { %344 = vmatpush3.bf16.msra.mxu0 %v407_v1  ;;  %391 = vmatpush3.bf16.msra.mxu1 %v407_v1  ;;  %v411_v5 = vld [vmem:[#allocation5 + $0x10] sm:$0xff]   ;;  %v412_v6 = vld [vmem:[#allocation5 + $0x58] sm:$0xff]   ;;  %v414_v8 = vld [vmem:[#allocation5 + $0x60] sm:$0xff]  }
  0x2a   :  { %345 = vmatprep.subr.bf16.mxu0 %v408_v2  ;;  %384 = vmatprep.subr.bf16.mxu1 %v408_v2  ;;  %v413_v7 = vld [vmem:[#allocation5 + $0x18] sm:$0xff]   ;;  %v415_v9 = vld [vmem:[#allocation5 + $0x20] sm:$0xff]   ;;  %v416_v10 = vld [vmem:[#allocation5 + $0x68] sm:$0xff]  }
  0x2b   :  { %v424_v11 = vld [vmem:[#allocation2 + $0x4] ss:$8 sps:$4 sm:$0xff]   ;;  %v418_v14 = vld [vmem:[#allocation5 + $0x70] sm:$0xff]   ;;  %v420_v16 = vld [vmem:[#allocation5 + $0x78] sm:$0xff]  }
  0x2c   :  { %v427_v12 = vld [vmem:[#allocation2 + $0x24] ss:$8 sps:$4 sm:$0xff]   ;;  %259 = vmatprep.mubr.bf16.mxu0 %v424_v11  ;;  %v419_v15 = vld [vmem:[#allocation5 + $0x30] sm:$0xff]   ;;  %v421_v17 = vld [vmem:[#allocation5 + $0x38] sm:$0xff]  }
  0x2d   :  { %346 = vmatpush3.bf16.msra.mxu0 %v409_v3  ;;  %392 = vmatpush3.bf16.msra.mxu1 %v409_v3  ;;  %v417_v13 = vld [vmem:[#allocation5 + $0x28] sm:$0xff]   ;;  %v428_v20 = vld [vmem:[#allocation2 + $0x14] ss:$8 sps:$4 sm:$0xff]   ;;  %v432_v22 = vld [vmem:[#allocation2 + $0x10] ss:$8 sps:$4 sm:$0xff]  }
  0x2e   :  { %347 = vmatprep.subr.bf16.mxu0 %v410_v4  ;;  %385 = vmatprep.subr.bf16.mxu1 %v410_v4  ;;  %v422_v18 = vld [vmem:[#allocation2] ss:$8 sps:$4 sm:$0xff]   ;;  %v430_v21 = vld [vmem:[#allocation2 + $0x34] ss:$8 sps:$4 sm:$0xff]   ;;  %v433_v23 = vld [vmem:[#allocation2 + $0x30] ss:$8 sps:$4 sm:$0xff]  }
  0x2f   :  { %275 = vmatprep.mubr.bf16.mxu1 %v427_v12  ;;  %v425_v19 = vld [vmem:[#allocation2 + $0x20] ss:$8 sps:$4 sm:$0xff]  }
  0x30   :  { %v318_v26 = vld [vmem:[%s580_s2] ss:$0 sm:$0xff]  ;;  %s512_s2 = smov [#allocation7]  }
  0x31   :  { %348 = vmatpush3.bf16.msra.mxu0 %v411_v5  ;;  %393 = vmatpush3.bf16.msra.mxu1 %v411_v5  ;;  %s305_s13 = sshll.u32 %s512_s2, 4  ;;  %s306_s13 = int_to_ptr.vmem [resolvable:$true] %s305_s13 }
  0x32   :  { %349 = vmatprep.subr.bf16.mxu0 %v412_v6  ;;  %386 = vmatprep.subr.bf16.mxu1 %v412_v6  ;;  %s478_s14 = scalar_lea.vmem %s306_s13, 1024  ;;  %p483_p3 = scmp.lt.s32.totalorder %s306_s13, %s306_s13 }
  0x33   :  { %p479_p2 = scmp.ne.s32.totalorder %s306_s13, %s478_s14  ;;  %p484_p4 = scmp.lt.s32.totalorder %s478_s14, %s478_s14 }
  0x35   :  { %350 = vmatpush3.bf16.msra.mxu0 %v413_v7  ;;  %394 = vmatpush3.bf16.msra.mxu1 %v413_v7  ;;  %p485_p5 = por %p484_p4, %p483_p3 }
  0x36   :  { %351 = vmatprep.subr.bf16.mxu0 %v414_v8  ;;  %387 = vmatprep.subr.bf16.mxu1 %v414_v8 }
  0x37   :  { %p486_p6 = pnand %p485_p5, %p479_p2 }
  0x39   :  { %352 = vmatpush3.bf16.msra.mxu0 %v415_v9  ;;  %395 = vmatpush3.bf16.msra.mxu1 %v415_v9 }
  0x3a   :  { %353 = vmatprep.subr.bf16.mxu0 %v416_v10  ;;  %388 = vmatprep.subr.bf16.mxu1 %v416_v10 }
  0x3d   :  { %354 = vmatpush3.bf16.msra.mxu0 %v417_v13  ;;  %396 = vmatpush3.bf16.msra.mxu1 %v417_v13 }
  0x3e   :  { %355 = vmatprep.subr.bf16.mxu0 %v418_v14  ;;  %389 = vmatprep.subr.bf16.mxu1 %v418_v14 }
  0x41   :  { %356 = vmatpush3.bf16.msra.mxu0 %v419_v15  ;;  %397 = vmatpush3.bf16.msra.mxu1 %v419_v15 }
  0x42   :  { %357 = vmatprep.subr.bf16.mxu0 %v420_v16  ;;  %390 = vmatprep.subr.bf16.mxu1 %v420_v16 }
  0x45   :  { %358 = vmatpush3.bf16.msra.mxu0 %v421_v17  ;;  %398 = vmatpush3.bf16.msra.mxu1 %v421_v17 }
  0x48   :  { %260 = vmatmul.mubr.bf16.vlgmr.msra.gmra.mrb[0].mxu0 %v422_v18  ;;  %276 = vmatmul.mubr.bf16.vlgmr.msra.gmra.mrb[0].mxu1 %v425_v19 }
  0x49   :  { %267 = vmatprep.mubr.bf16.mxu0 %v428_v20  ;;  %283 = vmatprep.mubr.bf16.mxu1 %v430_v21 }
  0x50   :  { %268 = vmatmul.mubr.bf16.gmra.mrb[4].mxu0 %v432_v22  ;;  %284 = vmatmul.mubr.bf16.gmra.mrb[4].mxu1 %v433_v23 }
 0x11b   :  { %v359_v24 = vpop.f32.mrb[0].mxu0  ;;  %v371_v25 = vpop.f32.mrb[0].mxu1 }
 0x11c   :  { %v360_v27 = vpop.f32.mrb[1].mxu0  ;;  %v372_v28 = vpop.f32.mrb[1].mxu1 }
 0x11d   :  { %v361_v29 = vadd.f32 %v360_v27, %v359_v24  ;;  %v373_v30 = vadd.f32 %v372_v28, %v371_v25  ;;  %v362_v31 = vpop.f32.mrb[2].mxu0  ;;  %v374_v32 = vpop.f32.mrb[2].mxu1 }
 0x11e   :  { %v363_v33 = vpop.f32.mrb[3].mxu0  ;;  %v375_v34 = vpop.f32.mrb[3].mxu1 }
 0x11f   :  { %v262_v35 = vadd.f32 %v361_v29, %v318_v26  ;;  %v278_v36 = vadd.f32 %v373_v30, %v318_v26  ;;  %v364_v37 = vadd.f32 %v363_v33, %v362_v31  ;;  %v376_v38 = vadd.f32 %v375_v34, %v374_v32 }
 0x121   :  { %292 = vst [vmem:[#allocation7] sm:$0xff] %v262_v35  ;;  %296 = vst [vmem:[#allocation7 + $0x20] sm:$0xff] %v278_v36  ;;  %v265_v39 = vadd.f32 %v364_v37, %v318_v26  ;;  %v281_v40 = vadd.f32 %v376_v38, %v318_v26 }
 0x123   :  { %293 = vst [vmem:[#allocation7 + $0x8] sm:$0xff] %v265_v39  ;;  %297 = vst [vmem:[#allocation7 + $0x28] sm:$0xff] %v281_v40  ;;  %v365_v41 = vpop.f32.mrb[4].mxu0  ;;  %v377_v42 = vpop.f32.mrb[4].mxu1 }
 0x124   :  { %v366_v43 = vpop.f32.mrb[5].mxu0  ;;  %v378_v44 = vpop.f32.mrb[5].mxu1 }
 0x125   :  { %v367_v45 = vadd.f32 %v366_v43, %v365_v41  ;;  %v379_v46 = vadd.f32 %v378_v44, %v377_v42  ;;  %v368_v47 = vpop.f32.mrb[6].mxu0  ;;  %v380_v48 = vpop.f32.mrb[6].mxu1 }
 0x126   :  { %v369_v49 = vpop.f32.mrb[7].mxu0  ;;  %v381_v50 = vpop.f32.mrb[7].mxu1 }
 0x127   :  { %v270_v51 = vadd.f32 %v367_v45, %v318_v26  ;;  %v286_v52 = vadd.f32 %v379_v46, %v318_v26  ;;  %v370_v53 = vadd.f32 %v369_v49, %v368_v47  ;;  %v382_v54 = vadd.f32 %v381_v50, %v380_v48 }
 0x129   :  { %294 = vst [vmem:[#allocation7 + $0x10] sm:$0xff] %v270_v51  ;;  %298 = vst [vmem:[#allocation7 + $0x30] sm:$0xff] %v286_v52  ;;  %v273_v55 = vadd.f32 %v370_v53, %v318_v26  ;;  %v289_v56 = vadd.f32 %v382_v54, %v318_v26 }
 0x12b   :  { %295 = vst [vmem:[#allocation7 + $0x18] sm:$0xff] %v273_v55  ;;  %299 = vst [vmem:[#allocation7 + $0x38] sm:$0xff] %v289_v56 }
 0x12c   :  { %489 = shalt.err (!%p486_p6)
}
 0x12d   :  { %s490_s17 = scalar_lea.hbm %s581_s3, 1024 }
 0x12e   :  { %p491_p7 = scmp.ne.s32.totalorder %s581_s3, %s490_s17  ;;  %p494_p8 = scmp.lt.u32.totalorder %s490_s17, %s581_s3 }
 0x130   :  { %p496_p9 = pnand %p494_p8, %p491_p7 }
 0x132   :  { %499 = shalt.err (!%p496_p9)
}
 0x133   :  { %311 = dma.vmem_to_hbm [thread:$0]  %s306_s13, 1024, %s581_s3, [#allocation4], %s507_s22, %s507_s22, %s508_s23  }
 0x134   :  { %504 = dma.done.wait [#allocation4], 1024  }
 0x135   :  { %505 = vsyncadd [#allocation4], 4294966272 }
 0x136   :  { %315 = vsyncpa [#allocation3], 1 }
 0x137   :  { %316 = vsyncpa [#allocation6], 1 }
 0x138   :  { %317 = vsyncpa [#allocation4], 1 }

</bundles_post_ra>
